<compile_context>
chip_gen: v7x
topology: tpu7x:2x2x1
jax: 0.10.0
libtpu: 0.0.40
codegen_flags: <defaults>
</compile_context>

<pallas_src>
import jax
import jax.numpy as jnp
from jax.experimental import pallas as pl
from jax.experimental.pallas import tpu as pltpu


def _round_up(x, m):
    return ((x + m - 1) // m) * m


def _pick_tile(npad, pref):
    """Largest multiple of 128 that is <= pref and divides npad (npad is a multiple of 128)."""
    pref = max(128, _round_up(pref, 128))
    t = min(pref, npad)
    while npad % t:
        t -= 128
    return t


def sharegcn_kernel(dinv_ref, a_ref, y_ref, out_ref, acc_ref):
    """One (row-tile, k-tile) step of  out = ReLU(dinv * (adj_t @ y))."""
    k = pl.program_id(1)

    @pl.when(k == 0)
    def _init():
        acc_ref[...] = jnp.zeros_like(acc_ref)

    # bf16 x bf16 -> f32 accumulation on the MXU.
    acc_ref[...] += jnp.dot(a_ref[...], y_ref[...],
                            preferred_element_type=jnp.float32)

    @pl.when(k == pl.num_programs(1) - 1)
    def _finish():
        # Row-side normalization + ReLU, f32 epilogue, lane-dense store.
        out_ref[...] = jnp.maximum(dinv_ref[...] * acc_ref[...], 0.0).astype(out_ref.dtype)


def share_gcn_forward(x, u_edge_index, u_edge_weight, v_edge_index, v_edge_weight,
                      weight, size_u, size_v, *, block_m=512, block_k=1024):
    """ShareGCN forward: build adj_t, hoist linear transform + gcn_norm, run the
    tiled normalize+propagate+ReLU Pallas kernel."""
    n = size_u + size_v
    cout, cin = weight.shape

    edge_index = jnp.concatenate([u_edge_index, v_edge_index], axis=1)    # (2, E)
    edge_weight = jnp.concatenate([u_edge_weight, v_edge_weight], axis=0).astype(jnp.float32)

    # Build adj_t directly (scatter at [col, row]) — SparseTensor(row, col, w).t() densified,
    # duplicates coalesce by summation; avoids materializing a second N^2 array for .T.
    adj_t = jnp.zeros((n, n), jnp.float32).at[edge_index[1], edge_index[0]].add(edge_weight)

    # Symmetric normalization (gcn_norm, add_self_loops=False), hoisted out of the kernel.
    deg = adj_t.sum(axis=1)
    dinv = jnp.where(deg > 0.0, jax.lax.rsqrt(deg), 0.0)[:, None]         # (N, 1) f32

    # Linear transform hoisted out (tiny vs. the N^2 propagation matmul); fold the
    # column-side normalization into the dense operand:  y = D * (X @ W^T).
    # TODO(synk): if Cin >> Cout one could instead propagate D*X and apply W^T afterwards.
    xw = jnp.dot(x.astype(jnp.float32), weight.astype(jnp.float32).T,
                 preferred_element_type=jnp.float32)                      # (N, Cout)
    y = dinv * xw

    # Pad rows/K to a multiple of 128 and channels to a lane-dense multiple of 128,
    # then pick the largest tiles (<= prefs) that divide the padded size.
    npad = _round_up(n, 128)
    cpad = _round_up(cout, 128)
    bm = _pick_tile(npad, block_m)
    bk = _pick_tile(npad, block_k)
    # Keep the (double-buffered) adjacency tile well inside the default VMEM budget.
    while bm * bk * 2 * 2 > (8 << 20) and bk > 128:
        bk = _pick_tile(npad, bk - 128)

    a_pad = jnp.pad(adj_t, ((0, npad - n), (0, npad - n))).astype(jnp.bfloat16)
    y_pad = jnp.pad(y, ((0, npad - n), (0, cpad - cout))).astype(jnp.bfloat16)
    d_pad = jnp.pad(dinv, ((0, npad - n), (0, 0)))

    grid = (npad // bm, npad // bk)

    cost = pl.CostEstimate(
        flops=2 * npad * npad * cpad,
        transcendentals=0,
        bytes_accessed=npad * npad * 2 + npad * cpad * 2 + npad * cpad * 4 + npad * 4,
    )

    out_pad = pl.pallas_call(
        sharegcn_kernel,
        out_shape=jax.ShapeDtypeStruct((npad, cpad), jnp.float32),
        grid_spec=pltpu.PrefetchScalarGridSpec(
            num_scalar_prefetch=0,
            grid=grid,
            in_specs=[
                pl.BlockSpec((bm, 1), lambda i, k: (i, 0)),        # dinv rows (f32)
                pl.BlockSpec((bm, bk), lambda i, k: (i, k)),       # adj_t tile (bf16)
                pl.BlockSpec((bk, cpad), lambda i, k: (k, 0)),     # y tile (bf16)
            ],
            out_specs=pl.BlockSpec((bm, cpad), lambda i, k: (i, 0)),
            scratch_shapes=[pltpu.VMEM((bm, cpad), jnp.float32)],
        ),
        compiler_params=pltpu.CompilerParams(
            dimension_semantics=("parallel", "arbitrary")),
        cost_estimate=cost,
    )(d_pad, a_pad, y_pad)

    return out_pad[:n, :cout]


def reference_forward(x, u_ei, u_ew, v_ei, v_ew, weight, size_u, size_v):
    n = size_u + size_v
    ei = jnp.concatenate([u_ei, v_ei], axis=1)
    ew = jnp.concatenate([u_ew, v_ew], axis=0)
    adj = jnp.zeros((n, n), jnp.float32).at[ei[0], ei[1]].add(ew)
    adj_t = adj.T
    deg = adj_t.sum(axis=1)
    d = jnp.where(deg > 0, deg ** -0.5, 0.0)
    a_norm = d[:, None] * adj_t * d[None, :]
    return jnp.maximum(a_norm @ (x @ weight.T), 0.0)


if __name__ == "__main__":
    key = jax.random.PRNGKey(0)
    size_u, size_v = 128, 128
    num_nodes = size_u + size_v
    in_channels, out_channels = 64, 64          # module defaults
    n_u_edges, n_v_edges = 2048, 2048

    k1, k2, k3, k4, k5, k6, k7 = jax.random.split(key, 7)

    # node features (after the module's dropout, which is identity in eval mode)
    x = jax.random.normal(k1, (num_nodes, in_channels), jnp.float32)

    # u-graph edges: u-nodes -> v-nodes ; v-graph edges: v-nodes -> u-nodes
    u_rows = jax.random.randint(k2, (n_u_edges,), 0, size_u)
    u_cols = jax.random.randint(k3, (n_u_edges,), size_u, num_nodes)
    u_edge_index = jnp.stack([u_rows, u_cols])
    u_edge_weight = jax.random.uniform(k4, (n_u_edges,), jnp.float32, 0.1, 1.0)

    v_rows = jax.random.randint(k5, (n_v_edges,), size_u, num_nodes)
    v_cols = jax.random.randint(k6, (n_v_edges,), 0, size_u)
    v_edge_index = jnp.stack([v_rows, v_cols])
    v_edge_weight = jax.random.uniform(k7, (n_v_edges,), jnp.float32, 0.1, 1.0)

    # GCNConv linear weight (out_channels, in_channels), no bias — deterministic init
    weight = jax.random.normal(jax.random.PRNGKey(42),
                               (out_channels, in_channels), jnp.float32) * 0.1

    # Small tiles here so the test exercises a multi-tile grid (parallel rows +
    # multi-step reduction with accumulator init/finalize); defaults are the perf tiles.
    out = share_gcn_forward(x, u_edge_index, u_edge_weight,
                            v_edge_index, v_edge_weight,
                            weight, size_u, size_v,
                            block_m=128, block_k=128)
    out = jax.block_until_ready(out)

    ref = reference_forward(x, u_edge_index, u_edge_weight,
                            v_edge_index, v_edge_weight,
                            weight, size_u, size_v)

    assert out.shape == (num_nodes, out_channels)
    # bf16 adjacency/operand with f32 accumulation: compare against the f32 reference with a
    # tolerance sized for bf16 quantization of the propagation matmul inputs.
    rel_err = float(jnp.max(jnp.abs(out - ref)) / (jnp.max(jnp.abs(ref)) + 1e-8))
    assert rel_err < 3e-2, f"mismatch vs reference: rel_err={rel_err}"

    print("KERNEL_OK")
</pallas_src>

<mosaic_0001>
module attributes {stable_mosaic.version = 11 : i64} {
  func.func @sharegcn_kernel(%arg0: i32, %arg1: i32, %arg2: memref<128x1xf32, #tpu.memory_space<vmem>>, %arg3: memref<128x128xbf16, #tpu.memory_space<vmem>>, %arg4: memref<128x128xbf16, #tpu.memory_space<vmem>>, %arg5: memref<128x128xf32, #tpu.memory_space<vmem>>, %arg6: memref<128x128xf32, #tpu.memory_space<vmem>>) attributes {dimension_semantics = [#tpu.dimension_semantics<parallel>, #tpu.dimension_semantics<arbitrary>], iteration_bounds = array<i64: 2, 2>, scalar_prefetch = 0 : i64, scratch_operands = 1 : i64, tpu.core_type = #tpu.core_type<tc>, window_params = [{transform_indices = @transform_0, window_bounds = array<i64: 128, 1>}, {transform_indices = @transform_1, window_bounds = array<i64: 128, 128>}, {transform_indices = @transform_2, window_bounds = array<i64: 128, 128>}, {transform_indices = @transform_3, window_bounds = array<i64: 128, 128>}]} {
    %c0_i32 = arith.constant 0 : i32
    %0 = arith.cmpi eq, %arg1, %c0_i32 : i32
    %1 = arith.extui %0 : i1 to i32
    %c0_i32_0 = arith.constant 0 : i32
    %2 = arith.cmpi ne, %1, %c0_i32_0 : i32
    scf.if %2 {
      %cst_9 = arith.constant 0.000000e+00 : f32
      %12 = vector.broadcast %cst_9 : f32 to vector<128x128xf32>
      %c0_10 = arith.constant 0 : index
      %c0_11 = arith.constant 0 : index
      %13 = vector.load %arg6[%c0_10, %c0_11] : memref<128x128xf32, #tpu.memory_space<vmem>>, vector<128x128xf32>
      tpu.vector_store %arg6[%c0_10, %c0_11], %12 {strides = array<i32>} : memref<128x128xf32, #tpu.memory_space<vmem>>, vector<128x128xf32>,
    } else {
    }
    %c0 = arith.constant 0 : index
    %c0_1 = arith.constant 0 : index
    %3 = vector.load %arg6[%c0, %c0_1] : memref<128x128xf32, #tpu.memory_space<vmem>>, vector<128x128xf32>
    %c0_2 = arith.constant 0 : index
    %c0_3 = arith.constant 0 : index
    %4 = vector.load %arg3[%c0_2, %c0_3] : memref<128x128xbf16, #tpu.memory_space<vmem>>, vector<128x128xbf16>
    %c0_4 = arith.constant 0 : index
    %c0_5 = arith.constant 0 : index
    %5 = vector.load %arg4[%c0_4, %c0_5] : memref<128x128xbf16, #tpu.memory_space<vmem>>, vector<128x128xbf16>
    %cst = arith.constant dense<0.000000e+00> : vector<128x128xf32>
    %6 = tpu.matmul %4, %5, %cst {dimension_numbers = #tpu.dot_dimension_numbers<[1], [0], [0], [1], [0, 0, 1, 1], [], []>} : vector<128x128xbf16>, vector<128x128xbf16>, vector<128x128xf32> -> vector<128x128xf32>
    %7 = arith.addf %3, %6 : vector<128x128xf32>
    %c0_6 = arith.constant 0 : index
    %c0_7 = arith.constant 0 : index
    %8 = vector.load %arg6[%c0_6, %c0_7] : memref<128x128xf32, #tpu.memory_space<vmem>>, vector<128x128xf32>
    tpu.vector_store %arg6[%c0_6, %c0_7], %7 {strides = array<i32>} : memref<128x128xf32, #tpu.memory_space<vmem>>, vector<128x128xf32>,
    %c1_i32 = arith.constant 1 : i32
    %9 = arith.cmpi eq, %arg1, %c1_i32 : i32
    %10 = arith.extui %9 : i1 to i32
    %c0_i32_8 = arith.constant 0 : i32
    %11 = arith.cmpi ne, %10, %c0_i32_8 : i32
    scf.if %11 {
      %c0_9 = arith.constant 0 : index
      %c0_10 = arith.constant 0 : index
      %12 = vector.load %arg2[%c0_9, %c0_10] : memref<128x1xf32, #tpu.memory_space<vmem>>, vector<128x1xf32>
      %c0_11 = arith.constant 0 : index
      %c0_12 = arith.constant 0 : index
      %13 = vector.load %arg6[%c0_11, %c0_12] : memref<128x128xf32, #tpu.memory_space<vmem>>, vector<128x128xf32>
      %14 = vector.broadcast %12 : vector<128x1xf32> to vector<128x128xf32>
      %15 = arith.mulf %14, %13 : vector<128x128xf32>
      %cst_13 = arith.constant 0.000000e+00 : f32
      %16 = vector.broadcast %cst_13 : f32 to vector<128x128xf32>
      %17 = arith.maximumf %15, %16 : vector<128x128xf32>
      %c0_14 = arith.constant 0 : index
      %c0_15 = arith.constant 0 : index
      %18 = vector.load %arg5[%c0_14, %c0_15] : memref<128x128xf32, #tpu.memory_space<vmem>>, vector<128x128xf32>
      tpu.vector_store %arg5[%c0_14, %c0_15], %17 {strides = array<i32>} : memref<128x128xf32, #tpu.memory_space<vmem>>, vector<128x128xf32>,
    } else {
    }
    return
  }
  func.func @transform_0(%arg0: i32, %arg1: i32) -> (i32, i32) {
    %c0_i32 = arith.constant 0 : i32
    %c0_i32_0 = arith.constant 0 : i32
    return %arg0, %c0_i32 : i32, i32
  }
  func.func @transform_1(%arg0: i32, %arg1: i32) -> (i32, i32) {
    %c0_i32 = arith.constant 0 : i32
    return %arg0, %arg1 : i32, i32
  }
  func.func @transform_2(%arg0: i32, %arg1: i32) -> (i32, i32) {
    %c0_i32 = arith.constant 0 : i32
    %c0_i32_0 = arith.constant 0 : i32
    return %arg1, %c0_i32 : i32, i32
  }
  func.func @transform_3(%arg0: i32, %arg1: i32) -> (i32, i32) {
    %c0_i32 = arith.constant 0 : i32
    %c0_i32_0 = arith.constant 0 : i32
    return %arg0, %c0_i32 : i32, i32
  }
}

</mosaic_0001>

<bundles_post_ra>
// kernel: tpu_custom_call.1
= control target key start
LH: loop header
LB: loop body
LE: loop exit
PB: predicated region body
PF: predicated region fallthrough
CT: control target
= control target key end

     0   :  { %s1724_s0 = inlined_call_operand.vmem [shape: f32[256,1], index: 0, kind: input, shape index: {}]   ;;  %s1725_s1 = inlined_call_operand.vmem [shape: bf16[256,256], index: 1, kind: input, shape index: {}]   ;;  %s1726_s2 = inlined_call_operand.hbm [shape: bf16[256,128], index: 2, kind: input, shape index: {}]   ;;  %s1727_s3 = inlined_call_operand.hbm [shape: f32[256,128], index: 3, kind: output, shape index: {}]  }
   0x1   :  { %1733 = sst [smem:[#allocation15_spill]] %s1725_s1 }
   0x2   :  { %8 = vsyncpa [#allocation5], 0 }
   0x3   :  { %10 = vsyncpa [#allocation5 + $0x1], 0 }
   0x4   :  { %11 = vsyncpa [#allocation6], 0 }
   0x5   :  { %13 = vsyncpa [#allocation6 + $0x1], 0  ;;  %s1380_s12 = smov 0   ;;  %s1382_s13 = smov 0  }
   0x6   :  { %s1384_s14 = smov 0   ;;  %s1386_s15 = smov 0  }
   0x7   :  { %s1388_s16 = smov 0   ;;  %s1390_s17 = smov 0  }
   0x8   :  { %s1392_s18 = smov 0   ;;  %s1394_s19 = smov 0  }
   0x9   :  { %s1396_s20 = smov 0   ;;  %s1398_s21 = smov 0  }
   0xa   :  { %s1400_s22 = smov 0   ;;  %s1402_s23 = smov 0  }
   0xb   :  { %s1404_s24 = smov 0  }
   0xc LB: > { %1734 = sst [smem:[#allocation10_spill]] %s1342_s22  ;;  %s940_s25 = sadd.s32 4294967295, %s1350_s24   ;;  %s1350_s24 = sphi %s1404_s24, %s19_s24   ;;  %s1346_s23 = sphi %s1402_s23, %s1763_s23   ;;  %s1342_s22 = sphi %s1400_s22, %s1752_s22   ;;  %s1338_s21 = sphi %s1398_s21, %s1751_s21   ;;  %s1334_s20 = sphi %s1396_s20, %s1750_s20   ;;  %s1330_s19 = sphi %s1394_s19, %s1762_s19   ;;  %s1326_s18 = sphi %s1392_s18, %s1761_s18   ;;  %s1322_s17 = sphi %s1390_s17, %s1760_s17   ;;  %s1318_s16 = sphi %s1388_s16, %s1759_s16   ;;  %s1314_s15 = sphi %s1386_s15, %s1758_s15   ;;  %s1310_s14 = sphi %s1384_s14, %s1757_s14   ;;  %s1306_s13 = sphi %s1382_s13, %s1756_s13   ;;  %s1302_s12 = sphi %s1380_s12, %s1755_s12  }
   0xd   : > { %1735 = sst [smem:[#allocation11_spill]] %s1346_s23  ;;  %s28_s27 = sadd.s32 1, %s1342_s22 }
   0xe   : > { %s31_s28 = sadd.s32 1, %s1346_s23  ;;  %p29_p0 = scmp.ge.s32.totalorder %s28_s27, 2 }
   0xf   : > { %s66_s29 = sadd.s32 1, %s1330_s19  ;;  %p73_p1 = scmp.ne.s32.totalorder %s1330_s19, %s1326_s18 }
  0x10   : > { %p74_p2 = scmp.eq.s32.totalorder %s1350_s24, 0  ;;  %s1765_s27 = smov (%p29_p0, %s28_s27), 0 }
  0x11   : > { %1736 = sst [smem:[#allocation12_spill]] %s1765_s27  ;;  %s1767_s28 = smov (!%p29_p0, %s31_s28), %s1346_s23 }
  0x12   : > { %s62_s30 = ssub.s32 %s1342_s22, %s1765_s27  ;;  %p1458_p3 = por %p74_p2, %p73_p1 }
  0x13   : > { %p33_p4 = scmp.ge.s32.totalorder %s1767_s28, 2  ;;  %p90_p5 = scmp.eq.s32.totalorder %s62_s30, 0 }
  0x14   : > { %s92_s5 = sadd.s32 1, %s1322_s17  ;;  %p99_p6 = scmp.ne.s32.totalorder %s1322_s17, %s1318_s16 }
  0x15   : > { %s1769_s28 = smov (%p33_p4, %s1767_s28), 0  ;;  %p105_p8 = scmp.ne.s32.totalorder %s1318_s16, %s1314_s15 }
  0x16   : > { %1738 = sst [smem:[#allocation13_spill]] %s1769_s28  ;;  %s61_s7 = ssub.s32 %s1346_s23, %s1769_s28 }
  0x17   : > { %s1468_s6 = scalar_select %p90_p5, %s1322_s17, %s92_s5  }
  0x18   : > { %p1472_p7 = por %p99_p6, %p74_p2  ;;  %s63_s9 = sor.u32 %s62_s30, %s61_s7 }
  0x19   : > { %p64_p9 = scmp.eq.s32.totalorder %s63_s9, 0  ;;  %p106_p10 = scmp.eq.s32.totalorder %s940_s25, 0 }
  0x1a   : > { %p116_p11 = scmp.eq.s32.totalorder %s61_s7, 0  ;;  %s118_s10 = sadd.s32 1, %s1310_s14 }
  0x1b   : > { %s1482_s11 = scalar_select %p64_p9, %s1330_s19, %s66_s29  }
  0x1c   : > { %p1484_p12 = por %p106_p10, %p105_p8  ;;  %p128_p13 = scmp.ne.s32.totalorder %s1310_s14, %s1306_s13 }
  0x1d   : > { %1740 = sst [smem:[#allocation14_spill]] %s1482_s11  ;;  %p129_p0 = scmp.eq.s32.totalorder %s940_s25, 3 }
  0x1e   : > { %s1491_s5 = scalar_select %p116_p11, %s1310_s14, %s118_s10  }
  0x1f   : > { %p134_p1 = scmp.ne.s32.totalorder %s1306_s13, %s1302_s12  ;;  %s1742_s28 = sadd.s32 4294967294, %s1350_s24  }
  0x20   : > { %p135_p2 = scmp.eq.s32.totalorder %s1742_s28, 3  ;;  %p1499_p4 = por %p129_p0, %p128_p13 }
  0x21   : > { %p943_p6 = scmp.ge.s32.totalorder %s1350_s24, 4 }
  0x22   : > { %s1743_s15 = scalar_select %p1499_p4, 1, 0 }
  0x23   : > { %p1503_p5 = por %p135_p2, %p134_p1  ;;  %151 = sbr.rel (%p943_p6) target bundleno = 88 (0x58), region = 16 }
  0x25   : > { %s1744_s30 = scalar_select %p1503_p5, 1, 0 }
  0x2a   : > { %163 = sbr.rel (!%p1458_p3) target bundleno = 62 (0x3e), region = 24  ;;  %s165_s25 = sand.u32 (%p1458_p3), 1, %s1330_s19  }
  0x2b   : > { %s980_s29 = sshll.u32 (%p1458_p3), %s1346_s23, 5  ;;  %s944_s28 = sshll.u32 (%p1458_p3), %s165_s25, 6 }
  0x2c   : > { %s170_s7 = sadd.s32 (%p1458_p3), %s1342_s22, %s980_s29  ;;  %s1745_s1 = sld [smem:[#allocation15_spill]] (%p1458_p3) }
  0x2d   : > { %s947_s9 = sshll.u32 (%p1458_p3), %s170_s7, 2  ;;  %s167_s4 = scalar_lea.vmem (%p1458_p3), [#allocation3], %s944_s28 }
  0x32   : > { %s1516_s11 = scalar_lea.vmem %s1745_s1, %s947_s9 }
  0x33   : > { %v188_v0 = vld [vmem:[%s1516_s11] sm:$0xf]  ;;  %v190_v1 = vld [vmem:[%s1516_s11 + $0x8] sm:$0xf]  ;;  %v192_v2 = vld [vmem:[%s1516_s11 + $0x10] sm:$0xf] }
  0x34   : > { %189 = vst [vmem:[%s167_s4] sm:$0xf] %v188_v0  ;;  %191 = vst [vmem:[%s167_s4 + $0x4] sm:$0xf] %v190_v1  ;;  %v194_v3 = vld [vmem:[%s1516_s11 + $0x18] sm:$0xf] }
  0x35   : > { %193 = vst [vmem:[%s167_s4 + $0x8] sm:$0xf] %v192_v2  ;;  %v196_v4 = vld [vmem:[%s1516_s11 + $0x20] sm:$0xf]  ;;  %v198_v5 = vld [vmem:[%s1516_s11 + $0x28] sm:$0xf] }
  0x36   : > { %195 = vst [vmem:[%s167_s4 + $0xc] sm:$0xf] %v194_v3  ;;  %197 = vst [vmem:[%s167_s4 + $0x10] sm:$0xf] %v196_v4  ;;  %v200_v6 = vld [vmem:[%s1516_s11 + $0x30] sm:$0xf] }
  0x37   : > { %199 = vst [vmem:[%s167_s4 + $0x14] sm:$0xf] %v198_v5  ;;  %v202_v7 = vld [vmem:[%s1516_s11 + $0x38] sm:$0xf]  ;;  %v204_v8 = vld [vmem:[%s1516_s11 + $0x40] sm:$0xf] }
  0x38   : > { %201 = vst [vmem:[%s167_s4 + $0x18] sm:$0xf] %v200_v6  ;;  %203 = vst [vmem:[%s167_s4 + $0x1c] sm:$0xf] %v202_v7  ;;  %v206_v9 = vld [vmem:[%s1516_s11 + $0x48] sm:$0xf] }
  0x39   : > { %205 = vst [vmem:[%s167_s4 + $0x20] sm:$0xf] %v204_v8  ;;  %v208_v10 = vld [vmem:[%s1516_s11 + $0x50] sm:$0xf]  ;;  %v210_v11 = vld [vmem:[%s1516_s11 + $0x58] sm:$0xf] }
  0x3a   : > { %207 = vst [vmem:[%s167_s4 + $0x24] sm:$0xf] %v206_v9  ;;  %209 = vst [vmem:[%s167_s4 + $0x28] sm:$0xf] %v208_v10  ;;  %v212_v12 = vld [vmem:[%s1516_s11 + $0x60] sm:$0xf] }
  0x3b   : > { %211 = vst [vmem:[%s167_s4 + $0x2c] sm:$0xf] %v210_v11  ;;  %v214_v13 = vld [vmem:[%s1516_s11 + $0x68] sm:$0xf]  ;;  %v216_v14 = vld [vmem:[%s1516_s11 + $0x70] sm:$0xf] }
  0x3c   : > { %213 = vst [vmem:[%s167_s4 + $0x30] sm:$0xf] %v212_v12  ;;  %215 = vst [vmem:[%s167_s4 + $0x34] sm:$0xf] %v214_v13  ;;  %v218_v15 = vld [vmem:[%s1516_s11 + $0x78] sm:$0xf] }
  0x3d   : > { %217 = vst [vmem:[%s167_s4 + $0x38] sm:$0xf] %v216_v14  ;;  %219 = vst [vmem:[%s167_s4 + $0x3c] sm:$0xf] %v218_v15 }
  0x3e PF: > { %s275_s27 = sand.u32 1, %s1322_s17   ;;  %s981_s25 = sshll.u32 %s1342_s22, 10 }
  0x3f   : > { %s948_s29 = sshll.u32 %s275_s27, 6  ;;  %s1539_s9 = scalar_lea.hbm %s1726_s2, %s981_s25 }
  0x40   : > { %s279_s10 = scalar_lea.vmem [#allocation4], %s948_s29  ;;  %s1543_s11 = scalar_lea.sflag [#allocation5], %s275_s27 }
  0x41   : > { %s286_s1 = sshll.u32 %s279_s10, 4  ;;  %s1184_s4 = scalar_lea.hbm %s1539_s9, 1024  ;;  %s1541_s1 = int_to_ptr.vmem [resolvable:$true] %s286_s1 }
  0x42   : > { %p1185_p3 = scmp.ne.s32.totalorder %s1539_s9, %s1184_s4  ;;  %s1188_s25 = scalar_lea.hbm %s1726_s2, 2048 }
  0x43   : > { %p1189_p10 = scmp.lt.u32.totalorder %s1539_s9, %s1726_s2  ;;  %p1190_p11 = scmp.lt.u32.totalorder %s1188_s25, %s1184_s4 }
  0x44   : > { %p1186_p8 = pnand %p1185_p3, %p1472_p7  ;;  %p1192_p0 = scmp.lt.u32.totalorder %s1184_s4, %s1539_s9 }
  0x45   : > { %p1191_p13 = por %p1190_p11, %p1189_p10 }
  0x46   : > { %p1187_p9 = pneg %p1186_p8 }
  0x47   : > { %p1193_p1 = por %p1192_p0, %p1191_p13 }
  0x49   : > { %p1194_p2 = pnand %p1193_p1, %p1187_p9 }
  0x4b   : > { %1197 = shalt.err (!%p1194_p2)
}
  0x4c   : > { %s1198_s27 = scalar_lea.vmem %s1541_s1, 1024  ;;  %s1352_s22 = smov [#allocation4]  }
  0x4d   : > { %p1199_p6 = scmp.ne.s32.totalorder %s1541_s1, %s1198_s27  ;;  %s1202_s23 = sshll.u32 %s1352_s22, 4  ;;  %s1203_s23 = int_to_ptr.vmem [resolvable:$false] %s1202_s23 }
  0x4e   : > { %s1204_s29 = scalar_lea.vmem %s1203_s23, 2048  ;;  %p1205_p5 = scmp.lt.s32.totalorder %s1541_s1, %s1203_s23 }
  0x4f   : > { %p1200_p3 = pnand %p1199_p6, %p1472_p7  ;;  %p1206_p4 = scmp.lt.s32.totalorder %s1204_s29, %s1198_s27 }
  0x51   : > { %p1201_p8 = pneg %p1200_p3  ;;  %p1207_p10 = por %p1206_p4, %p1205_p5 }
  0x53   : > { %p1208_p11 = pnand %p1207_p10, %p1201_p8 }
  0x55   : > { %1211 = shalt.err (!%p1208_p11)
}
  0x56   : > { %s1353_s10 = smov 64   ;;  %s1354_s4 = smov 4  }
  0x57   : > { %1047 = dma.hbm_to_vmem [thread:$0]  (%p1472_p7), %s1539_s9, 1024, %s1541_s1, %s1543_s11, %s1353_s10, %s1353_s10, %s1354_s4  }
  0x58 PF: > { %p951_p9 = scmp.ge.s32.totalorder %s1350_s24, 1  ;;  %p294_p13 = scmp.lt.s32.totalorder %s1350_s24, 5 }
  0x5a   : > { %p295_p0 = pnand %p951_p9, %p294_p13 }
  0x5b   : > { %s301_s25 = sand.u32 (!%p295_p0), 1, %s1326_s18   ;;  %s307_s28 = sand.u32 (!%p295_p0), 1, %s1318_s16  }
  0x5c   : > { %298 = sbr.rel (%p295_p0) target bundleno = 517 (0x205), region = 69  ;;  %s952_s7 = sshll.u32 (!%p295_p0), %s301_s25, 6 }
  0x5d   : > { %s953_s27 = sshll.u32 (!%p295_p0), %s307_s28, 6  ;;  %s1571_s22 = scalar_lea.vmem (!%p295_p0), [#allocation3], %s952_s7 }
  0x5e   : > { %s308_s23 = scalar_lea.sflag (!%p295_p0), [#allocation5], %s307_s28  ;;  %s1573_s29 = scalar_lea.vmem (!%p295_p0), [#allocation4], %s953_s27 }
  0x63   : > { %1293 = dma.done.wait (%p1484_p12), %s308_s23, 1024  }
  0x64   : > { %1295 = vsyncadd (%p1484_p12), %s308_s23, 4294966272  ;;  %s340_s1 = sand.u32 1, %s1306_s13   ;;  %s955_s8 = sshll.u32 %s1338_s21, 4 }
  0x65   : > { %s954_s18 = sshll.u32 %s340_s1, 7  ;;  %p344_p7 = scmp.lt.s32.totalorder %s955_s8, 31 }
  0x66   : > { %s1588_s25 = scalar_lea.vmem [#allocation7], %s954_s18  ;;  %p957_p4 = scmp.ne.s32.totalorder %s1334_s20, 0 }
  0x67   : > { %s1771_s8 = smov (!%p344_p7, %s955_s8), 31  ;;  %v1355_v16 = vmov (!%p957_p4), 0.0  }
  0x68   : > { %s956_s9 = sshll.u32 %s1771_s8, 3  ;;  %356 = sbr.rel (%p957_p4) target bundleno = 112 (0x70), region = 81  ;;  %357 = vst [vmem:[#allocation2] sm:$0xff] (!%p957_p4), %v1355_v16  ;;  %358 = vst [vmem:[#allocation2 + $0x8] sm:$0xff] (!%p957_p4), %v1355_v16 }
  0x69   : > { %s1586_s4 = scalar_lea.vmem %s1724_s0, %s956_s9  ;;  %359 = vst [vmem:[#allocation2 + $0x10] sm:$0xff] (!%p957_p4), %v1355_v16  ;;  %360 = vst [vmem:[#allocation2 + $0x18] sm:$0xff] (!%p957_p4), %v1355_v16 }
  0x6a   : > { %361 = vst [vmem:[#allocation2 + $0x20] sm:$0xff] (!%p957_p4), %v1355_v16  ;;  %362 = vst [vmem:[#allocation2 + $0x28] sm:$0xff] (!%p957_p4), %v1355_v16 }
  0x6b   : > { %363 = vst [vmem:[#allocation2 + $0x30] sm:$0xff] (!%p957_p4), %v1355_v16  ;;  %364 = vst [vmem:[#allocation2 + $0x38] sm:$0xff] (!%p957_p4), %v1355_v16 }
  0x6c   : > { %365 = vst [vmem:[#allocation2 + $0x40] sm:$0xff] (!%p957_p4), %v1355_v16  ;;  %366 = vst [vmem:[#allocation2 + $0x48] sm:$0xff] (!%p957_p4), %v1355_v16 }
  0x6d   : > { %367 = vst [vmem:[#allocation2 + $0x50] sm:$0xff] (!%p957_p4), %v1355_v16  ;;  %368 = vst [vmem:[#allocation2 + $0x58] sm:$0xff] (!%p957_p4), %v1355_v16 }
  0x6e   : > { %369 = vst [vmem:[#allocation2 + $0x60] sm:$0xff] (!%p957_p4), %v1355_v16  ;;  %370 = vst [vmem:[#allocation2 + $0x68] sm:$0xff] (!%p957_p4), %v1355_v16 }
  0x6f   : > { %371 = vst [vmem:[#allocation2 + $0x70] sm:$0xff] %v1355_v16  ;;  %372 = vst [vmem:[#allocation2 + $0x78] sm:$0xff] %v1355_v16 }
  0x70 PF: > { %v1166_v17 = vld [vmem:[%s1573_s29] sm:$0xff]   ;;  %v1167_v18 = vld [vmem:[%s1573_s29 + $0x8] sm:$0xff]   ;;  %v1168_v19 = vld [vmem:[%s1573_s29 + $0x10] sm:$0xff]   ;;  %p974_p12 = scmp.ne.s32.totalorder %s1334_s20, 1 }
  0x71   : > { %999 = vmatprep.subr.bf16.mxu0 %v1166_v17  ;;  %1031 = vmatprep.subr.bf16.mxu1 %v1166_v17  ;;  %v1169_v20 = vld [vmem:[%s1573_s29 + $0x18] sm:$0xff]   ;;  %v1174_v21 = vld [vmem:[%s1571_s22] sm:$0xff]   ;;  %v1171_v24 = vld [vmem:[%s1573_s29 + $0x28] sm:$0xff]  }
  0x72   : > { %1000 = vmatpush3.bf16.msra.mxu0 %v1166_v17  ;;  %1039 = vmatpush3.bf16.msra.mxu1 %v1166_v17  ;;  %v1175_v22 = vld [vmem:[%s1571_s22 + $0x20] sm:$0xff]   ;;  %v1172_v25 = vld [vmem:[%s1573_s29 + $0x30] sm:$0xff]   ;;  %v1173_v26 = vld [vmem:[%s1573_s29 + $0x38] sm:$0xff]  }
  0x73   : > { %1001 = vmatprep.subr.bf16.mxu0 %v1167_v18  ;;  %1032 = vmatprep.subr.bf16.mxu1 %v1167_v18  ;;  %v1170_v23 = vld [vmem:[%s1573_s29 + $0x20] sm:$0xff]   ;;  %v1176_v27 = vld [vmem:[%s1571_s22 + $0x8] sm:$0xff]   ;;  %v1178_v29 = vld [vmem:[%s1571_s22 + $0x10] sm:$0xff]  }
  0x74   : > { %1015 = vmatprep.mubr.bf16.mxu0 %v1174_v21  ;;  %1023 = vmatprep.mubr.bf16.mxu1 %v1175_v22  ;;  %v1177_v28 = vld [vmem:[%s1571_s22 + $0x28] sm:$0xff]   ;;  %v1179_v30 = vld [vmem:[%s1571_s22 + $0x30] sm:$0xff]   ;;  %v1180_v31 = vld [vmem:[%s1571_s22 + $0x18] sm:$0xff]  }
  0x75   : > { %v1181_v32 = vld [vmem:[%s1571_s22 + $0x38] sm:$0xff]   ;;  %v375_v33 = vld [vmem:[#allocation2 + $0x10] sm:$0xff]  ;;  %v373_v35 = vld [vmem:[#allocation2] sm:$0xff] }
  0x76   : > { %1002 = vmatpush3.bf16.msra.mxu0 %v1167_v18  ;;  %1040 = vmatpush3.bf16.msra.mxu1 %v1167_v18  ;;  %v383_v34 = vld [vmem:[#allocation2 + $0x50] sm:$0xff]  ;;  %v381_v36 = vld [vmem:[#allocation2 + $0x40] sm:$0xff]  ;;  %v376_v39 = vld [vmem:[#allocation2 + $0x18] sm:$0xff] }
  0x77   : > { %1003 = vmatprep.subr.bf16.mxu0 %v1168_v19  ;;  %1033 = vmatprep.subr.bf16.mxu1 %v1168_v19  ;;  %v384_v40 = vld [vmem:[#allocation2 + $0x58] sm:$0xff]  ;;  %v374_v45 = vld [vmem:[#allocation2 + $0x8] sm:$0xff]  ;;  %v379_v57 = vld [vmem:[#allocation2 + $0x30] sm:$0xff] }
  0x78   : > { %v382_v46 = vld [vmem:[#allocation2 + $0x48] sm:$0xff]  ;;  %v387_v58 = vld [vmem:[#allocation2 + $0x70] sm:$0xff]  ;;  %v377_v59 = vld [vmem:[#allocation2 + $0x20] sm:$0xff] }
  0x79   : > { %v385_v60 = vld [vmem:[#allocation2 + $0x60] sm:$0xff]  ;;  %v380_v63 = vld [vmem:[#allocation2 + $0x38] sm:$0xff]  ;;  %v378_v5 = vld [vmem:[#allocation2 + $0x28] sm:$0xff] }
  0x7a   : > { %1004 = vmatpush3.bf16.msra.mxu0 %v1168_v19  ;;  %1041 = vmatpush3.bf16.msra.mxu1 %v1168_v19  ;;  %v388_v0 = vld [vmem:[#allocation2 + $0x78] sm:$0xff]  ;;  %v386_v6 = vld [vmem:[#allocation2 + $0x68] sm:$0xff]  ;;  %v652_v17 = vld [vmem:[%s1586_s4 + $0x10] sm:$0xff] (!%p974_p12)  ;;  %v1356_v19 = vmov (!%p974_p12), 0  }
  0x7b   : > { %1005 = vmatprep.subr.bf16.mxu0 %v1169_v20  ;;  %1034 = vmatprep.subr.bf16.mxu1 %v1169_v20  ;;  %v650_v18 = vld [vmem:[%s1586_s4] sm:$0xff] (!%p974_p12)  ;;  %v651_v21 = vld [vmem:[%s1586_s4 + $0x8] sm:$0xff] (!%p974_p12) }
  0x7c   : > { %1183 = vset.pattern.permute.xlu1 (!%p974_p12), %v1356_v19  ;;  %1182 = vset.pattern.permute.xlu0 (!%p974_p12), %v1356_v19  ;;  %v655_v22 = vld [vmem:[%s1586_s4 + $0x28] sm:$0xff] (!%p974_p12) }
  0x7d   : > { %694 = vperm.xlu1 (!%p974_p12), %1183, %v652_v17   ;;  %684 = vperm.xlu0 (!%p974_p12), %1182, %v650_v18  }
  0x7e   : > { %1006 = vmatpush3.bf16.msra.mxu0 %v1169_v20  ;;  %1042 = vmatpush3.bf16.msra.mxu1 %v1169_v20  ;;  %v653_v20 = vld [vmem:[%s1586_s4 + $0x18] sm:$0xff] (!%p974_p12) }
  0x7f   : > { %1007 = vmatprep.subr.bf16.mxu0 %v1170_v23  ;;  %1035 = vmatprep.subr.bf16.mxu1 %v1170_v23 }
  0x81   : > { %699 = vperm.xlu1 (!%p974_p12), %1183, %v653_v20   ;;  %689 = vperm.xlu0 (!%p974_p12), %1182, %v651_v21  }
  0x82   : > { %1008 = vmatpush3.bf16.msra.mxu0 %v1170_v23  ;;  %1043 = vmatpush3.bf16.msra.mxu1 %v1170_v23  ;;  %v654_v23 = vld [vmem:[%s1586_s4 + $0x20] sm:$0xff] (!%p974_p12) }
  0x83   : > { %1009 = vmatprep.subr.bf16.mxu0 %v1171_v24  ;;  %1036 = vmatprep.subr.bf16.mxu1 %v1171_v24 }
  0x85   : > { %709 = vperm.xlu1 (!%p974_p12), %1183, %v655_v22   ;;  %704 = vperm.xlu0 (!%p974_p12), %1182, %v654_v23  }
  0x86   : > { %1010 = vmatpush3.bf16.msra.mxu0 %v1171_v24  ;;  %1044 = vmatpush3.bf16.msra.mxu1 %v1171_v24  ;;  %v657_v24 = vld [vmem:[%s1586_s4 + $0x38] sm:$0xff] (!%p974_p12) }
  0x87   : > { %1011 = vmatprep.subr.bf16.mxu0 %v1172_v25  ;;  %1037 = vmatprep.subr.bf16.mxu1 %v1172_v25 }
  0x89   : > { %719 = vperm.xlu1 (!%p974_p12), %1183, %v657_v24  }
  0x8a   : > { %1012 = vmatpush3.bf16.msra.mxu0 %v1172_v25  ;;  %1045 = vmatpush3.bf16.msra.mxu1 %v1172_v25  ;;  %v656_v25 = vld [vmem:[%s1586_s4 + $0x30] sm:$0xff] (!%p974_p12) }
  0x8b   : > { %1013 = vmatprep.subr.bf16.mxu0 %v1173_v26  ;;  %1038 = vmatprep.subr.bf16.mxu1 %v1173_v26 }
  0x8c   : > { %714 = vperm.xlu0 (!%p974_p12), %1182, %v656_v25  }
  0x8e   : > { %1014 = vmatpush3.bf16.msra.mxu0 %v1173_v26  ;;  %1046 = vmatpush3.bf16.msra.mxu1 %v1173_v26  ;;  %v659_v26 = vld [vmem:[%s1586_s4 + $0x48] sm:$0xff] (!%p974_p12) }
  0x8f   : > { %729 = vperm.xlu1 (!%p974_p12), %1183, %v659_v26  }
  0x91   : > { %1016 = vmatmul.mubr.bf16.vlgmr.msra.gmra.mrb[0].mxu0 %v1176_v27  ;;  %1024 = vmatmul.mubr.bf16.vlgmr.msra.gmra.mrb[0].mxu1 %v1177_v28  ;;  %v658_v27 = vld [vmem:[%s1586_s4 + $0x40] sm:$0xff] (!%p974_p12)  ;;  %v661_v28 = vld [vmem:[%s1586_s4 + $0x58] sm:$0xff] (!%p974_p12) }
  0x92   : > { %1019 = vmatprep.mubr.bf16.mxu0 %v1178_v29  ;;  %1027 = vmatprep.mubr.bf16.mxu1 %v1179_v30  ;;  %v660_v29 = vld [vmem:[%s1586_s4 + $0x50] sm:$0xff] (!%p974_p12)  ;;  %v663_v30 = vld [vmem:[%s1586_s4 + $0x68] sm:$0xff] (!%p974_p12) }
  0x93   : > { %724 = vperm.xlu0 (!%p974_p12), %1182, %v658_v27   ;;  %739 = vperm.xlu1 (!%p974_p12), %1183, %v661_v28  }
  0x97   : > { %734 = vperm.xlu0 (!%p974_p12), %1182, %v660_v29   ;;  %749 = vperm.xlu1 (!%p974_p12), %1183, %v663_v30  }
  0x99   : > { %1020 = vmatmul.mubr.bf16.gmra.mrb[4].mxu0 %v1180_v31  ;;  %1028 = vmatmul.mubr.bf16.gmra.mrb[4].mxu1 %v1181_v32  ;;  %v662_v31 = vld [vmem:[%s1586_s4 + $0x60] sm:$0xff] (!%p974_p12)  ;;  %v665_v32 = vld [vmem:[%s1586_s4 + $0x78] sm:$0xff] (!%p974_p12) }
  0x9b   : > { %744 = vperm.xlu0 (!%p974_p12), %1182, %v662_v31   ;;  %759 = vperm.xlu1 (!%p974_p12), %1183, %v665_v32  }
 0x164   : > { %v1017_v37 = vpop.f32.mrb[0].mxu0  ;;  %v1025_v38 = vpop.f32.mrb[0].mxu1 }
 0x165   : > { %v616_v41 = vadd.f32 %v1017_v37, %v375_v33  ;;  %v624_v42 = vadd.f32 %v1025_v38, %v383_v34  ;;  %v551_v43 = vpop.f32.mrb[1].mxu0  ;;  %v583_v44 = vpop.f32.mrb[1].mxu1  ;;  %v664_v33 = vld [vmem:[%s1586_s4 + $0x70] sm:$0xff] (!%p974_p12) }
 0x166   : > { %v614_v47 = vadd.f32 %v551_v43, %v373_v35  ;;  %v622_v48 = vadd.f32 %v583_v44, %v381_v36  ;;  %v1018_v49 = vpop.f32.mrb[2].mxu0  ;;  %v1026_v50 = vpop.f32.mrb[2].mxu1  ;;  %754 = vperm.xlu0 (!%p974_p12), %1182, %v664_v33  }
 0x167   : > { %632 = vst [vmem:[#allocation2 + $0x10] sm:$0xff] %v616_v41  ;;  %640 = vst [vmem:[#allocation2 + $0x50] sm:$0xff] %v624_v42  ;;  %v617_v51 = vadd.f32 %v1018_v49, %v376_v39  ;;  %v625_v52 = vadd.f32 %v1026_v50, %v384_v40  ;;  %v554_v53 = vpop.f32.mrb[3].mxu0  ;;  %v586_v54 = vpop.f32.mrb[3].mxu1 }
 0x168   : > { %630 = vst [vmem:[#allocation2] sm:$0xff] %v614_v47  ;;  %638 = vst [vmem:[#allocation2 + $0x40] sm:$0xff] %v622_v48  ;;  %v615_v55 = vadd.f32 %v554_v53, %v374_v45  ;;  %v623_v56 = vadd.f32 %v586_v54, %v382_v46  ;;  %v695_v36 = vpop.permute.xlu1 (!%p974_p12), %694  ;;  %v685_v37 = vpop.permute.xlu0 (!%p974_p12), %684 }
 0x169   : > { %633 = vst [vmem:[#allocation2 + $0x18] sm:$0xff] %v617_v51  ;;  %641 = vst [vmem:[#allocation2 + $0x58] sm:$0xff] %v625_v52 }
 0x16a   : > { %631 = vst [vmem:[#allocation2 + $0x8] sm:$0xff] %v615_v55  ;;  %639 = vst [vmem:[#allocation2 + $0x48] sm:$0xff] %v623_v56 }
 0x16c   : > { %v1021_v61 = vpop.f32.mrb[4].mxu0  ;;  %v1029_v62 = vpop.f32.mrb[4].mxu1  ;;  %649 = sbr.rel (%p974_p12) target bundleno = 491 (0x1eb), region = 85 }
 0x16d   : > { %v620_v1 = vadd.f32 %v1021_v61, %v379_v57  ;;  %v628_v2 = vadd.f32 %v1029_v62, %v387_v58  ;;  %v567_v3 = vpop.f32.mrb[5].mxu0  ;;  %v599_v4 = vpop.f32.mrb[5].mxu1 }
 0x16e   : > { %v618_v7 = vadd.f32 %v567_v3, %v377_v59  ;;  %v626_v8 = vadd.f32 %v599_v4, %v385_v60  ;;  %v1022_v9 = vpop.f32.mrb[6].mxu0  ;;  %v1030_v10 = vpop.f32.mrb[6].mxu1  ;;  %v668_v34 = vld [vmem:[#allocation2 + $0x10] sm:$0xff] (!%p974_p12) }
 0x16f   : > { %636 = vst [vmem:[#allocation2 + $0x30] sm:$0xff] %v620_v1  ;;  %644 = vst [vmem:[#allocation2 + $0x70] sm:$0xff] %v628_v2  ;;  %v621_v11 = vadd.f32 %v1022_v9, %v380_v63  ;;  %v629_v12 = vadd.f32 %v1030_v10, %v388_v0  ;;  %v570_v13 = vpop.f32.mrb[7].mxu0  ;;  %v602_v14 = vpop.f32.mrb[7].mxu1  ;;  %v666_v35 = vld [vmem:[#allocation2] sm:$0xff] (!%p974_p12)  ;;  %v764_v38 = vmul.f32 (!%p974_p12), %v695_v36, %v668_v34  ;;  %v676_v9 = vld [vmem:[#allocation2 + $0x50] sm:$0xff] (!%p974_p12) }
 0x170   : > { %634 = vst [vmem:[#allocation2 + $0x20] sm:$0xff] %v618_v7  ;;  %642 = vst [vmem:[#allocation2 + $0x60] sm:$0xff] %v626_v8  ;;  %v619_v15 = vadd.f32 %v570_v13, %v378_v5  ;;  %v627_v16 = vadd.f32 %v602_v14, %v386_v6  ;;  %v762_v39 = vmul.f32 (!%p974_p12), %v685_v37, %v666_v35  ;;  %v669_v40 = vld [vmem:[#allocation2 + $0x18] sm:$0xff] (!%p974_p12)  ;;  %v700_v44 = vpop.permute.xlu1 (!%p974_p12), %699  ;;  %v690_v45 = vpop.permute.xlu0 (!%p974_p12), %689  ;;  %v674_v1 = vld [vmem:[#allocation2 + $0x40] sm:$0xff] (!%p974_p12) }
 0x171   : > { %637 = vst [vmem:[#allocation2 + $0x38] sm:$0xff] %v621_v11  ;;  %645 = vst [vmem:[#allocation2 + $0x78] sm:$0xff] %v629_v12  ;;  %v667_v41 = vld [vmem:[#allocation2 + $0x8] sm:$0xff] (!%p974_p12)  ;;  %v780_v42 = vmax.f32 (!%p974_p12), %v764_v38, 0.0  ;;  %v765_v46 = vmul.f32 (!%p974_p12), %v700_v44, %v669_v40  ;;  %v677_v8 = vld [vmem:[#allocation2 + $0x58] sm:$0xff] (!%p974_p12) }
 0x172   : > { %635 = vst [vmem:[#allocation2 + $0x28] sm:$0xff] %v619_v15  ;;  %643 = vst [vmem:[#allocation2 + $0x68] sm:$0xff] %v627_v16  ;;  %v778_v43 = vmax.f32 (!%p974_p12), %v762_v39, 0.0  ;;  %v763_v47 = vmul.f32 (!%p974_p12), %v690_v45, %v667_v41  ;;  %v675_v0 = vld [vmem:[#allocation2 + $0x48] sm:$0xff] (!%p974_p12) }
 0x173   : > { %796 = vst [vmem:[%s1588_s25 + $0x10] sm:$0xff] %v780_v42  ;;  %v781_v50 = vmax.f32 %v765_v46, 0.0 }
 0x174   : > { %794 = vst [vmem:[%s1588_s25] sm:$0xff] %v778_v43  ;;  %v779_v51 = vmax.f32 %v763_v47, 0.0  ;;  %v710_v52 = vpop.permute.xlu1 %709  ;;  %v705_v53 = vpop.permute.xlu0 %704 }
 0x175   : > { %797 = vst [vmem:[%s1588_s25 + $0x18] sm:$0xff] %v781_v50 }
 0x176   : > { %795 = vst [vmem:[%s1588_s25 + $0x8] sm:$0xff] %v779_v51  ;;  %v672_v57 = vld [vmem:[#allocation2 + $0x30] sm:$0xff] }
 0x177   : > { %v670_v49 = vld [vmem:[#allocation2 + $0x20] sm:$0xff]  ;;  %v680_v25 = vld [vmem:[#allocation2 + $0x70] sm:$0xff] }
 0x178   : > { %v766_v55 = vmul.f32 %v705_v53, %v670_v49  ;;  %v673_v56 = vld [vmem:[#allocation2 + $0x38] sm:$0xff]  ;;  %v720_v60 = vpop.permute.xlu1 %719  ;;  %v715_v61 = vpop.permute.xlu0 %714  ;;  %v678_v17 = vld [vmem:[#allocation2 + $0x60] sm:$0xff] }
 0x179   : > { %v671_v48 = vld [vmem:[#allocation2 + $0x28] sm:$0xff]  ;;  %v769_v62 = vmul.f32 %v720_v60, %v673_v56  ;;  %v768_v63 = vmul.f32 %v715_v61, %v672_v57  ;;  %v681_v24 = vld [vmem:[#allocation2 + $0x78] sm:$0xff] }
 0x17a   : > { %v767_v54 = vmul.f32 %v710_v52, %v671_v48  ;;  %v782_v59 = vmax.f32 %v766_v55, 0.0  ;;  %v679_v16 = vld [vmem:[#allocation2 + $0x68] sm:$0xff] }
 0x17b   : > { %v785_v2 = vmax.f32 %v769_v62, 0.0  ;;  %v784_v3 = vmax.f32 %v768_v63, 0.0 }
 0x17c   : > { %v783_v58 = vmax.f32 %v767_v54, 0.0  ;;  %798 = vst [vmem:[%s1588_s25 + $0x20] sm:$0xff] %v782_v59  ;;  %v730_v4 = vpop.permute.xlu1 %729  ;;  %v725_v5 = vpop.permute.xlu0 %724 }
 0x17d   : > { %801 = vst [vmem:[%s1588_s25 + $0x38] sm:$0xff] %v785_v2  ;;  %800 = vst [vmem:[%s1588_s25 + $0x30] sm:$0xff] %v784_v3  ;;  %v771_v6 = vmul.f32 %v730_v4, %v675_v0  ;;  %v770_v7 = vmul.f32 %v725_v5, %v674_v1 }
 0x17e   : > { %799 = vst [vmem:[%s1588_s25 + $0x28] sm:$0xff] %v783_v58 }
 0x17f   : > { %v787_v10 = vmax.f32 %v771_v6, 0.0  ;;  %v786_v11 = vmax.f32 %v770_v7, 0.0 }
 0x180   : > { %v740_v12 = vpop.permute.xlu1 %739  ;;  %v735_v13 = vpop.permute.xlu0 %734 }
 0x181   : > { %803 = vst [vmem:[%s1588_s25 + $0x48] sm:$0xff] %v787_v10  ;;  %802 = vst [vmem:[%s1588_s25 + $0x40] sm:$0xff] %v786_v11  ;;  %v773_v14 = vmul.f32 %v740_v12, %v677_v8  ;;  %v772_v15 = vmul.f32 %v735_v13, %v676_v9 }
 0x183   : > { %v789_v18 = vmax.f32 %v773_v14, 0.0  ;;  %v788_v19 = vmax.f32 %v772_v15, 0.0 }
 0x184   : > { %v750_v20 = vpop.permute.xlu1 %749  ;;  %v745_v21 = vpop.permute.xlu0 %744 }
 0x185   : > { %805 = vst [vmem:[%s1588_s25 + $0x58] sm:$0xff] %v789_v18  ;;  %804 = vst [vmem:[%s1588_s25 + $0x50] sm:$0xff] %v788_v19  ;;  %v775_v22 = vmul.f32 %v750_v20, %v679_v16  ;;  %v774_v23 = vmul.f32 %v745_v21, %v678_v17 }
 0x187   : > { %v791_v26 = vmax.f32 %v775_v22, 0.0  ;;  %v790_v27 = vmax.f32 %v774_v23, 0.0 }
 0x188   : > { %v760_v28 = vpop.permute.xlu1 %759 }
 0x189   : > { %807 = vst [vmem:[%s1588_s25 + $0x68] sm:$0xff] %v791_v26  ;;  %806 = vst [vmem:[%s1588_s25 + $0x60] sm:$0xff] %v790_v27  ;;  %v777_v30 = vmul.f32 %v760_v28, %v681_v24 }
 0x18b   : > { %v793_v32 = vmax.f32 %v777_v30, 0.0 }
 0x18d   : > { %809 = vst [vmem:[%s1588_s25 + $0x78] sm:$0xff] %v793_v32 }
 0x1e5   : > { %v755_v29 = vpop.permute.xlu0 %754 }
 0x1e6   : > { %v776_v31 = vmul.f32 %v755_v29, %v680_v25 }
 0x1e8   : > { %v792_v33 = vmax.f32 %v776_v31, 0.0 }
 0x1ea   : > { %808 = vst [vmem:[%s1588_s25 + $0x70] sm:$0xff] %v792_v33 }
 0x1eb PF: > { %s982_s20 = sshll.u32 %s1338_s21, 11  ;;  %s824_s27 = sshll.u32 %s1588_s25, 4  ;;  %s1647_s27 = int_to_ptr.vmem [resolvable:$true] %s824_s27 }
 0x1ec   : > { %s1644_s7 = scalar_lea.hbm %s1727_s3, %s982_s20  ;;  %s1651_s22 = scalar_lea.sflag [#allocation6], %s340_s1 }
 0x1ed   : > { %s1212_s23 = scalar_lea.vmem %s1647_s27, 2048  ;;  %p1746_p1 = scmp.ne.s32.totalorder %s1743_s15, 0 }
 0x1ee   : > { %p1213_p5 = scmp.ne.s32.totalorder %s1647_s27, %s1212_s23  ;;  %s1357_s21 = smov [#allocation7]  }
 0x1ef   : > { %s1216_s29 = sshll.u32 %s1357_s21, 4  ;;  %s1217_s29 = int_to_ptr.vmem [resolvable:$false] %s1216_s29 }
 0x1f0   : > { %p1214_p2 = pnand %p1213_p5, %p1746_p1  ;;  %s1218_s8 = scalar_lea.vmem %s1217_s29, 4096 }
 0x1f1   : > { %p1219_p3 = scmp.lt.s32.totalorder %s1647_s27, %s1217_s29  ;;  %p1220_p8 = scmp.lt.s32.totalorder %s1218_s8, %s1212_s23 }
 0x1f2   : > { %p1215_p6 = pneg %p1214_p2 }
 0x1f3   : > { %p1221_p10 = por %p1220_p8, %p1219_p3 }
 0x1f5   : > { %p1222_p11 = pnand %p1221_p10, %p1215_p6 }
 0x1f7   : > { %1225 = shalt.err (!%p1222_p11)
}
 0x1f8   : > { %s1226_s1 = scalar_lea.hbm %s1644_s7, 2048  ;;  %s1230_s11 = scalar_lea.hbm %s1727_s3, 4096 }
 0x1f9   : > { %p1227_p9 = scmp.ne.s32.totalorder %s1644_s7, %s1226_s1  ;;  %p1231_p7 = scmp.lt.u32.totalorder %s1644_s7, %s1727_s3 }
 0x1fa   : > { %p1232_p4 = scmp.lt.u32.totalorder %s1230_s11, %s1226_s1  ;;  %p1234_p5 = scmp.lt.u32.totalorder %s1226_s1, %s1644_s7 }
 0x1fb   : > { %p1228_p13 = pnand %p1227_p9, %p1746_p1 }
 0x1fc   : > { %p1233_p12 = por %p1232_p4, %p1231_p7 }
 0x1fd   : > { %p1229_p0 = pneg %p1228_p13 }
 0x1fe   : > { %p1235_p2 = por %p1234_p5, %p1233_p12 }
 0x200   : > { %p1236_p6 = pnand %p1235_p2, %p1229_p0 }
 0x202   : > { %1239 = shalt.err (!%p1236_p6)
}
 0x203   : > { %s1358_s25 = smov 128   ;;  %s1359_s20 = smov 8  }
 0x204   : > { %1049 = dma.vmem_to_hbm [thread:$0]  (%p1746_p1), %s1647_s27, 2048, %s1644_s7, %s1651_s22, %s1358_s25, %s1358_s25, %s1359_s20  }
 0x205 PF: > { %p1055_p3 = scmp.ge.s32.totalorder %s1350_s24, 2  ;;  %s839_s26 = sand.u32 1, %s1302_s12  }
 0x206   : > { %p1747_p8 = scmp.ne.s32.totalorder %s1744_s30, 0  ;;  %s840_s28 = scalar_lea.sflag [#allocation6], %s839_s26 }
 0x208   : > { %p1052_p10 = pnand %p1055_p3, %p1747_p8 }
 0x20a   : > { %1297 = dma.done.wait (!%p1052_p10), %s840_s28, 2048  }
 0x20b   : > { %1299 = vsyncadd (!%p1052_p10), %s840_s28, 4294965248  ;;  %s19_s24 = sadd.s32 1, %s1350_s24   ;;  %s1749_s7 = sld [smem:[#allocation14_spill]] }
 0x20c   : > { %p1680_p11 = scmp.ge.s32.totalorder %s19_s24, 6   ;;  %s1750_s20 = sld [smem:[#allocation10_spill]] }
 0x20d   : > { %s1751_s21 = sld [smem:[#allocation11_spill]]  ;;  %s1752_s22 = sld [smem:[#allocation12_spill]] }
 0x20e   : > { %s1753_s30 = sld [smem:[#allocation13_spill]]  ;;  %s1755_s12 = smov %s1306_s13 }
 0x20f   : > { %s1756_s13 = smov %s1310_s14  ;;  %s1757_s14 = smov %s1491_s5 }
 0x210   : > { %s1758_s15 = smov %s1318_s16  ;;  %s1759_s16 = smov %s1322_s17 }
 0x211   : > { %s1760_s17 = smov %s1468_s6  ;;  %s1761_s18 = smov %s1330_s19 }
 0x212   : > { %s1762_s19 = smov %s1749_s7  ;;  %18 = sbr.rel (!%p1680_p11) target bundleno = 12 (0xc), region = 137 }
 0x214   : > { %s1763_s23 = smov %s1753_s30 }
 0x219   :  { %845 = vsyncpa [#allocation5], 1 }
 0x21a   :  { %847 = vsyncpa [#allocation5 + $0x1], 1 }
 0x21b   :  { %848 = vsyncpa [#allocation6], 1 }
 0x21c   :  { %850 = vsyncpa [#allocation6 + $0x1], 1 }

</bundles_post_ra>
